<compile_context>
chip_gen: v7x
topology: tpu7x:2x2x1
jax: 0.10.0
libtpu: 0.0.40
codegen_flags: <defaults>
</compile_context>

<pallas_src>
import jax
import jax.numpy as jnp
from jax import lax
from jax.experimental import pallas as pl
from jax.experimental.pallas import tpu as pltpu


def _cdiv(a, b):
    return -(-a // b)


def _round_up(x, m):
    return _cdiv(x, m) * m


def _sublane_multiple(dtype):
    itemsize = jnp.dtype(dtype).itemsize
    return max(8, 8 * (4 // max(1, itemsize)))  # f32:8, bf16:16, i8/fp8:32


def _vmem_capacity_bytes():
    try:
        info = pltpu.get_tpu_info()
        cap = getattr(info, "vmem_capacity_bytes", None)
        if cap:
            return int(cap)
    except Exception:
        pass
    return 64 * 1024 * 1024  # conservative fallback (v7x-sized)


def _make_linear_kernel(op_dtype, rem_k):
    """y_tile = x_tile @ w_tile accumulated over the K grid axis (axis 2)."""

    def kernel(x_ref, w_ref, o_ref, acc_ref):
        k_idx = pl.program_id(2)

        @pl.when(k_idx == 0)
        def _():
            acc_ref[...] = jnp.zeros_like(acc_ref)

        # Cast the activation tile in VMEM (VPU op hidden under the DMA).
        x = x_ref[...].astype(op_dtype)
        if rem_k:
            # The last K block of x extends past input_dim; zero the garbage tail
            # columns so they contribute nothing to the accumulation.
            is_last = k_idx == pl.num_programs(2) - 1
            col = lax.broadcasted_iota(jnp.int32, x.shape, 1)
            keep = jnp.logical_or(jnp.logical_not(is_last), col < rem_k)
            x = jnp.where(keep, x, jnp.zeros_like(x))

        acc_ref[...] += jnp.dot(x, w_ref[...].astype(op_dtype),
                                preferred_element_type=jnp.float32)

        @pl.when(k_idx == pl.num_programs(2) - 1)
        def _():
            o_ref[...] = acc_ref[...].astype(o_ref.dtype)

    return kernel


def token_mapper_forward(one_hot_token, weight, *, block_m=512, max_tk=2048,
                         max_tn=1024, mxu_dtype=None):
    """Equivalent of TokenMapper.forward (nn.Linear, bias=False): y = x @ W.T.

    one_hot_token: (..., input_dim) one-hot or soft token mixture (any float/int dtype)
    weight:        (output_dim, input_dim)  -- nn.Linear.weight layout
    returns:       (..., output_dim)
    """
    input_dim = one_hot_token.shape[-1]
    output_dim, k_w = weight.shape
    assert k_w == input_dim, (weight.shape, input_dim)

    lead_shape = one_hot_token.shape[:-1]
    compute_dtype = jnp.result_type(one_hot_token.dtype, weight.dtype)
    x = one_hot_token.reshape(-1, input_dim)  # no cast / no pad: handled in-kernel
    m = x.shape[0]
    if m == 0:
        return jnp.zeros((*lead_shape, output_dim), compute_dtype)

    op_dtype = jnp.dtype(mxu_dtype) if mxu_dtype is not None else compute_dtype

    xb = jnp.dtype(x.dtype).itemsize
    wb = jnp.dtype(op_dtype).itemsize
    ob = jnp.dtype(compute_dtype).itemsize

    cap = _vmem_capacity_bytes()
    budget = int(cap * 0.75)  # headroom for Mosaic internal scratch / semaphores

    # ---- N tiling: lane-dense blocks (multiples of 128) -------------------------
    tn = min(max_tn, _round_up(output_dim, 128))
    grid_n = _cdiv(output_dim, tn)
    n_pad = grid_n * tn

    # ---- K tiling: keep K whole when it fits comfortably, else tile -------------
    def footprint(tm_, tk_):
        return (2 * tm_ * tk_ * xb        # double-buffered x tiles
                + 2 * tk_ * tn * wb       # double-buffered weight tiles
                + 2 * tm_ * tn * ob       # double-buffered output tiles
                + tm_ * tn * 4)           # f32 accumulator scratch

    sub = max(_sublane_multiple(x.dtype), _sublane_multiple(compute_dtype))
    if footprint(sub, input_dim) <= budget // 2:
        tk, grid_k, k_pad, rem_k = input_dim, 1, input_dim, 0
    else:
        tk = min(max_tk, _round_up(input_dim, 128))
        grid_k = _cdiv(input_dim, tk)
        k_pad = grid_k * tk
        rem_k = input_dim - (grid_k - 1) * tk
        if rem_k == tk:
            rem_k = 0

    # ---- M tiling: budget-driven; >= 2 tiles so both v7x TensorCores get work ----
    per_row = 2 * tk * xb + 2 * tn * ob + tn * 4
    w_bytes = 2 * tk * tn * wb
    if budget > w_bytes:
        tm_budget = max(sub, ((budget - w_bytes) // per_row) // sub * sub)
    else:
        tm_budget = sub
    tm_split = _round_up(_cdiv(m, 2), sub) if m > sub else _round_up(m, sub)
    tm = max(sub, min(_round_up(block_m, sub), tm_budget, tm_split))
    grid_m = _cdiv(m, tm)

    # One-time relayout of the (small) weight: transpose to (K, N), cast, zero-pad
    # to (k_pad, n_pad) so weight blocks never read out of bounds and output stores
    # stay lane-dense (unmasked vst).
    wt = weight.astype(op_dtype).T
    if k_pad != input_dim or n_pad != output_dim:
        wt = jnp.pad(wt, ((0, k_pad - input_dim), (0, n_pad - output_dim)))

    actual = footprint(tm, tk)
    vmem_limit = int(min(max(2 * actual, 16 << 20), int(cap * 0.85)))

    cost = pl.CostEstimate(
        flops=2 * m * input_dim * n_pad,
        transcendentals=0,
        bytes_accessed=m * input_dim * xb + k_pad * n_pad * wb + m * n_pad * ob,
    )

    kernel = _make_linear_kernel(op_dtype, rem_k)

    out = pl.pallas_call(
        kernel,
        out_shape=jax.ShapeDtypeStruct((m, n_pad), compute_dtype),
        grid_spec=pltpu.PrefetchScalarGridSpec(
            num_scalar_prefetch=0,
            grid=(grid_m, grid_n, grid_k),
            in_specs=[
                pl.BlockSpec((tm, tk), lambda i, j, k: (i, k)),  # activations
                pl.BlockSpec((tk, tn), lambda i, j, k: (k, j)),  # weight (K, N)
            ],
            out_specs=pl.BlockSpec((tm, tn), lambda i, j, k: (i, j)),
            scratch_shapes=[pltpu.VMEM((tm, tn), jnp.float32)],
        ),
        compiler_params=pltpu.CompilerParams(
            dimension_semantics=("parallel", "parallel", "arbitrary"),
            vmem_limit_bytes=vmem_limit,
        ),
        cost_estimate=cost,
    )(x, wt)

    if n_pad != output_dim:
        out = out[:, :output_dim]
    return out.reshape(*lead_shape, output_dim)


if __name__ == "__main__":
    # TokenMapper maps (soft) one-hot token vectors of size input_dim to
    # embeddings of size output_dim.
    batch, seq, input_dim, output_dim = 2, 8, 32, 64

    key = jax.random.PRNGKey(0)
    k_x, k_w = jax.random.split(key)

    # Deterministic synthetic "parameters" (nn.Linear default init range).
    bound = 1.0 / jnp.sqrt(jnp.float32(input_dim))
    weight = jax.random.uniform(
        k_w, (output_dim, input_dim), jnp.float32, minval=-bound, maxval=bound
    )

    # One-hot token inputs, shape (batch, seq, input_dim).
    token_ids = jax.random.randint(k_x, (batch, seq), 0, input_dim)
    one_hot = jax.nn.one_hot(token_ids, input_dim, dtype=jnp.float32)

    y = token_mapper_forward(one_hot, weight)
    y = jax.block_until_ready(y)

    # Reference check against plain JAX (same semantics as x @ W.T).
    y_ref = jnp.einsum("bsi,oi->bso", one_hot, weight)
    assert y.shape == (batch, seq, output_dim)
    assert jnp.allclose(y, y_ref, atol=1e-5, rtol=1e-5)

    print("KERNEL_OK")
</pallas_src>

<mosaic_0001>
module attributes {stable_mosaic.version = 11 : i64} {
  func.func @kernel(%arg0: i32, %arg1: i32, %arg2: i32, %arg3: memref<8x32xf32, #tpu.memory_space<vmem>>, %arg4: memref<32x128xf32, #tpu.memory_space<vmem>>, %arg5: memref<8x128xf32, #tpu.memory_space<vmem>>, %arg6: memref<8x128xf32, #tpu.memory_space<vmem>>) attributes {dimension_semantics = [#tpu.dimension_semantics<parallel>, #tpu.dimension_semantics<parallel>, #tpu.dimension_semantics<arbitrary>], iteration_bounds = array<i64: 2, 1, 1>, scalar_prefetch = 0 : i64, scratch_operands = 1 : i64, tpu.core_type = #tpu.core_type<tc>, window_params = [{transform_indices = @transform_0, window_bounds = array<i64: 8, 32>}, {transform_indices = @transform_1, window_bounds = array<i64: 32, 128>}, {transform_indices = @transform_2, window_bounds = array<i64: 8, 128>}]} {
    %c0_i32 = arith.constant 0 : i32
    %0 = arith.cmpi eq, %arg2, %c0_i32 : i32
    %1 = arith.extui %0 : i1 to i32
    %c0_i32_0 = arith.constant 0 : i32
    %2 = arith.cmpi ne, %1, %c0_i32_0 : i32
    scf.if %2 {
      %cst_10 = arith.constant 0.000000e+00 : f32
      %12 = vector.broadcast %cst_10 : f32 to vector<8x128xf32>
      %c0_11 = arith.constant 0 : index
      %c0_12 = arith.constant 0 : index
      %13 = vector.load %arg6[%c0_11, %c0_12] : memref<8x128xf32, #tpu.memory_space<vmem>>, vector<8x128xf32>
      tpu.vector_store %arg6[%c0_11, %c0_12], %12 {strides = array<i32>} : memref<8x128xf32, #tpu.memory_space<vmem>>, vector<8x128xf32>,
    } else {
    }
    %c0 = arith.constant 0 : index
    %c0_1 = arith.constant 0 : index
    %3 = vector.load %arg3[%c0, %c0_1] : memref<8x32xf32, #tpu.memory_space<vmem>>, vector<8x32xf32>
    %c0_2 = arith.constant 0 : index
    %c0_3 = arith.constant 0 : index
    %4 = vector.load %arg6[%c0_2, %c0_3] : memref<8x128xf32, #tpu.memory_space<vmem>>, vector<8x128xf32>
    %c0_4 = arith.constant 0 : index
    %c0_5 = arith.constant 0 : index
    %5 = vector.load %arg4[%c0_4, %c0_5] : memref<32x128xf32, #tpu.memory_space<vmem>>, vector<32x128xf32>
    %cst = arith.constant dense<0.000000e+00> : vector<8x128xf32>
    %6 = tpu.matmul %3, %5, %cst {dimension_numbers = #tpu.dot_dimension_numbers<[1], [0], [0], [1], [0, 0, 1, 1], [], []>} : vector<8x32xf32>, vector<32x128xf32>, vector<8x128xf32> -> vector<8x128xf32>
    %7 = arith.addf %4, %6 : vector<8x128xf32>
    %c0_6 = arith.constant 0 : index
    %c0_7 = arith.constant 0 : index
    %8 = vector.load %arg6[%c0_6, %c0_7] : memref<8x128xf32, #tpu.memory_space<vmem>>, vector<8x128xf32>
    tpu.vector_store %arg6[%c0_6, %c0_7], %7 {strides = array<i32>} : memref<8x128xf32, #tpu.memory_space<vmem>>, vector<8x128xf32>,
    %c0_i32_8 = arith.constant 0 : i32
    %9 = arith.cmpi eq, %arg2, %c0_i32_8 : i32
    %10 = arith.extui %9 : i1 to i32
    %c0_i32_9 = arith.constant 0 : i32
    %11 = arith.cmpi ne, %10, %c0_i32_9 : i32
    scf.if %11 {
      %c0_10 = arith.constant 0 : index
      %c0_11 = arith.constant 0 : index
      %12 = vector.load %arg6[%c0_10, %c0_11] : memref<8x128xf32, #tpu.memory_space<vmem>>, vector<8x128xf32>
      %c0_12 = arith.constant 0 : index
      %c0_13 = arith.constant 0 : index
      %13 = vector.load %arg5[%c0_12, %c0_13] : memref<8x128xf32, #tpu.memory_space<vmem>>, vector<8x128xf32>
      tpu.vector_store %arg5[%c0_12, %c0_13], %12 {strides = array<i32>} : memref<8x128xf32, #tpu.memory_space<vmem>>, vector<8x128xf32>,
    } else {
    }
    return
  }
  func.func @transform_0(%arg0: i32, %arg1: i32, %arg2: i32) -> (i32, i32) {
    %c0_i32 = arith.constant 0 : i32
    return %arg0, %arg2 : i32, i32
  }
  func.func @transform_1(%arg0: i32, %arg1: i32, %arg2: i32) -> (i32, i32) {
    %c0_i32 = arith.constant 0 : i32
    return %arg2, %arg1 : i32, i32
  }
  func.func @transform_2(%arg0: i32, %arg1: i32, %arg2: i32) -> (i32, i32) {
    %c0_i32 = arith.constant 0 : i32
    return %arg0, %arg1 : i32, i32
  }
}

</mosaic_0001>

<bundles_post_ra>
// kernel: tpu_custom_call.1
= control target key start
LH: loop header
LB: loop body
LE: loop exit
PB: predicated region body
PF: predicated region fallthrough
CT: control target
= control target key end

     0   :  { %7 = vsyncpa [#allocation4], 0  ;;  %s913_s0 = inlined_call_operand.hbm [shape: f32[16,32], index: 0, kind: input, shape index: {}]   ;;  %s914_s1 = inlined_call_operand.hbm [shape: f32[32,128], index: 1, kind: input, shape index: {}]   ;;  %s915_s2 = inlined_call_operand.hbm [shape: f32[16,128], index: 2, kind: output, shape index: {}]  }
   0x1   :  { %9 = vsyncpa [#allocation4 + $0x1], 0 }
   0x2   :  { %10 = vsyncpa [#allocation7], 0 }
   0x3   :  { %11 = vsyncpa [#allocation5], 0 }
   0x4   :  { %13 = vsyncpa [#allocation5 + $0x1], 0  ;;  %s699_s9 = smov 0   ;;  %s701_s10 = smov 0  }
   0x5   :  { %s703_s11 = smov 0   ;;  %s705_s12 = smov 0  }
   0x6   :  { %s707_s13 = smov 0   ;;  %s709_s14 = smov 0  }
   0x7 LB: > { %s414_s15 = sadd.s32 4294967295, %s674_s14   ;;  %s415_s16 = sadd.s32 4294967294, %s674_s14   ;;  %s674_s14 = sphi %s709_s14, %s19_s14   ;;  %s670_s13 = sphi %s707_s13, %s939_s13   ;;  %s666_s12 = sphi %s705_s12, %s938_s12   ;;  %s662_s11 = sphi %s703_s11, %s937_s11   ;;  %s658_s10 = sphi %s701_s10, %s936_s10   ;;  %s654_s9 = sphi %s699_s9, %s935_s9  }
   0x8   : > { %p60_p0 = scmp.ne.s32.totalorder %s658_s10, %s654_s9  ;;  %p733_p1 = scmp.eq.s32.totalorder %s414_s15, 0 }
   0x9   : > { %p737_p2 = scmp.eq.s32.totalorder %s414_s15, 1  ;;  %p120_p3 = scmp.eq.s32.totalorder %s415_s16, 1 }
   0xa   : > { %s920_s17 = scalar_select %p733_p1, 1, 0 }
   0xb   : > { %s921_s18 = scalar_select %p737_p2, 1, 0 }
   0xc   : > { %p743_p4 = por %p733_p1, %p60_p0  ;;  %p416_p5 = scmp.ge.s32.totalorder %s674_s14, 1 }
   0xd   : > { %p748_p6 = por %p120_p3, %p60_p0  ;;  %p127_p7 = scmp.lt.s32.totalorder %s674_s14, 3 }
   0xe   : > { %s922_s19 = scalar_select %p743_p4, 1, 0 }
   0xf   : > { %s923_s20 = scalar_select %p748_p6, 1, 0 }
  0x10   : > { %p753_p8 = pnand %p416_p5, %p127_p7  ;;  %s676_s22 = smov [#allocation6]  }
  0x11   : > { %s143_s23 = sshll.u32 %s676_s22, 4  ;;  %s38_s25 = sadd.s32 1, %s670_s13  ;;  %s144_s23 = int_to_ptr.vmem [resolvable:$true] %s143_s23 }
  0x12   : > { %s924_s21 = scalar_select %p753_p8, 1, 0 }
  0x13   : > { %p460_p9 = pneg %p753_p8  ;;  %s530_s28 = scalar_lea.hbm %s914_s1, 512 }
  0x14   : > { %p531_p12 = scmp.ne.s32.totalorder %s914_s1, %s530_s28  ;;  %p537_p5 = scmp.lt.u32.totalorder %s530_s28, %s914_s1 }
  0x15   : > { %p762_p11 = pnand %p460_p9, %p733_p1 }
  0x17   : > { %p532_p13 = pneg %p762_p11 }
  0x19   : > { %p533_p0 = pnand %p532_p13, %p531_p12 }
  0x1b   : > { %p534_p3 = pneg %p533_p0 }
  0x1d   : > { %p539_p7 = pnand %p537_p5, %p534_p3 }
  0x1f   : > { %542 = shalt.err (!%p539_p7)
}
  0x20   : > { %s543_s5 = scalar_lea.vmem %s144_s23, 512  ;;  %p551_p1 = scmp.lt.s32.totalorder %s144_s23, %s144_s23 }
  0x21   : > { %p544_p9 = scmp.ne.s32.totalorder %s144_s23, %s543_s5  ;;  %p552_p4 = scmp.lt.s32.totalorder %s543_s5, %s543_s5 }
  0x23   : > { %p546_p10 = pnand %p544_p9, %p532_p13  ;;  %p553_p8 = por %p552_p4, %p551_p1 }
  0x25   : > { %p547_p6 = pneg %p546_p10 }
  0x27   : > { %p554_p2 = pnand %p553_p8, %p547_p6 }
  0x29   : > { %557 = shalt.err (!%p554_p2)
}
  0x2a   : > { %s677_s6 = smov 128   ;;  %s678_s7 = smov 8  }
  0x2b   : > { %463 = dma.hbm_to_vmem [thread:$0]  (!%p762_p11), %s914_s1, 512, %s144_s23, [#allocation7], %s677_s6, %s677_s6, %s678_s7  }
  0x2c   : > { %p40_p1 = scmp.ge.s32.totalorder %s38_s25, 2  ;;  %s47_s16 = sadd.s32 1, %s662_s11 }
  0x2d   : > { %p54_p2 = scmp.ne.s32.totalorder %s662_s11, %s658_s10  ;;  %p55_p4 = scmp.eq.s32.totalorder %s674_s14, 0 }
  0x2e   : > { %s941_s25 = smov (%p40_p1, %s38_s25), 0  ;;  %p927_p8 = scmp.ne.s32.totalorder %s921_s18, 0 }
  0x2f   : > { %p789_p6 = por %p55_p4, %p54_p2  ;;  %s42_s24 = ssub.s32 %s670_s13, %s941_s25 }
  0x30   : > { %p795_p10 = por %p927_p8, %p54_p2  ;;  %p473_p12 = scmp.lt.s32.totalorder %s674_s14, 2 }
  0x31   : > { %p45_p11 = scmp.eq.s32.totalorder %s42_s24, 0  ;;  %s157_s23 = sand.u32 1, %s662_s11  }
  0x32   : > { %s419_s27 = sshll.u32 %s157_s23, 3  ;;  %s420_s29 = sshll.u32 %s670_s13, 7 }
  0x33   : > { %s804_s28 = scalar_select %p45_p11, %s662_s11, %s47_s16  }
  0x34   : > { %s810_s4 = scalar_lea.hbm %s913_s0, %s420_s29  ;;  %s161_s18 = scalar_lea.vmem [#allocation3], %s419_s27 }
  0x35   : > { %s169_s5 = sshll.u32 %s161_s18, 4  ;;  %p816_p13 = pnand %p473_p12, %p789_p6  ;;  %s812_s5 = int_to_ptr.vmem [resolvable:$true] %s169_s5 }
  0x36   : > { %s158_s7 = scalar_lea.sflag [#allocation4], %s157_s23  ;;  %s558_s8 = scalar_lea.hbm %s810_s4, 128 }
  0x37   : > { %p559_p0 = scmp.ne.s32.totalorder %s810_s4, %s558_s8  ;;  %p560_p3 = pneg %p816_p13 }
  0x38   : > { %s563_s24 = scalar_lea.hbm %s913_s0, 256  ;;  %p564_p9 = scmp.lt.u32.totalorder %s810_s4, %s913_s0 }
  0x39   : > { %p561_p5 = pnand %p560_p3, %p559_p0  ;;  %p565_p1 = scmp.lt.u32.totalorder %s563_s24, %s558_s8 }
  0x3a   : > { %p567_p4 = scmp.lt.u32.totalorder %s558_s8, %s810_s4 }
  0x3b   : > { %p562_p7 = pneg %p561_p5  ;;  %p566_p2 = por %p565_p1, %p564_p9 }
  0x3d   : > { %p568_p6 = por %p567_p4, %p566_p2 }
  0x3f   : > { %p569_p8 = pnand %p568_p6, %p562_p7 }
  0x41   : > { %572 = shalt.err (!%p569_p8)
}
  0x42   : > { %s573_s23 = scalar_lea.vmem %s812_s5, 128  ;;  %s679_s29 = smov [#allocation3]  }
  0x43   : > { %p574_p12 = scmp.ne.s32.totalorder %s812_s5, %s573_s23  ;;  %s578_s30 = sshll.u32 %s679_s29, 4  ;;  %s579_s30 = int_to_ptr.vmem [resolvable:$false] %s578_s30 }
  0x44   : > { %s580_s3 = scalar_lea.vmem %s579_s30, 256  ;;  %p581_p5 = scmp.lt.s32.totalorder %s812_s5, %s579_s30 }
  0x45   : > { %p576_p11 = pnand %p574_p12, %p560_p3  ;;  %p582_p9 = scmp.lt.s32.totalorder %s580_s3, %s573_s23 }
  0x47   : > { %p577_p0 = pneg %p576_p11  ;;  %p583_p1 = por %p582_p9, %p581_p5 }
  0x49   : > { %p584_p2 = pnand %p583_p1, %p577_p0 }
  0x4b   : > { %587 = shalt.err (!%p584_p2)
}
  0x4c   : > { %467 = dma.hbm_to_vmem [thread:$0]  (!%p816_p13), %s810_s4, 128, %s812_s5, %s158_s7  }
  0x4d   : > { %p930_p7 = scmp.ne.s32.totalorder %s924_s21, 0 }
  0x4e   : > { %s848_s18 = sand.u32 (!%p930_p7), 1, %s658_s10   ;;  %p931_p3 = scmp.ne.s32.totalorder (!%p930_p7), %s922_s19, 0 }
  0x4f   : > { %178 = sbr.rel (%p930_p7) target bundleno = 327 (0x147), region = 28  ;;  %s422_s8 = sshll.u32 (!%p930_p7), %s848_s18, 3 }
  0x50   : > { %s181_s15 = scalar_lea.sflag (!%p930_p7), [#allocation4], %s848_s18  ;;  %s184_s16 = scalar_lea.vmem (!%p930_p7), [#allocation3], %s422_s8 }
  0x56   : > { %641 = dma.done.wait (%p931_p3), %s181_s15, 128  }
  0x57   : > { %643 = vsyncadd (%p931_p3), %s181_s15, 4294967168  ;;  %p932_p4 = scmp.ne.s32.totalorder %s920_s17, 0 }
  0x59   : > { %645 = dma.done.wait (%p932_p4), [#allocation7], 512  }
  0x5a   : > { %647 = vsyncadd (%p932_p4), [#allocation7], 4294966784  ;;  %v680_v0 = vmov 0.0|0.0   ;;  %vm681_vm0 = vmmov 0   ;;  %v682_v1 = vmov 0.0   ;;  %v217_v2 = vld [vmem:[#allocation6] sm:$0xff] }
  0x5b   : > { %446 = vmatprep.subr.bf16.mxu0 %v680_v0  ;;  %443 = vmatprep.mubr.msk.f32.mxu0 %vm681_vm0, %v682_v1  ;;  %v218_v3 = vld [vmem:[#allocation6 + $0x8] sm:$0xff]  ;;  %v219_v4 = vld [vmem:[#allocation6 + $0x10] sm:$0xff]  ;;  %v220_v6 = vld [vmem:[#allocation6 + $0x18] sm:$0xff]  ;;  %vm221_vm1 = vcmask 261120   ;;  %s208_s17 = scalar_lea.vmem [#allocation8], %s422_s8  ;;  %s427_s21 = sshll.u32 %s666_s12, 7 }
  0x5c   : > { %v447_v5 = vpack.c.bf16 %v218_v3, %v217_v2  ;;  %v450_v7 = vpack.c.bf16 %v220_v6, %v219_v4  ;;  %v215_v8 = vld [vmem:[%s184_s16] sm:$0xff]  ;;  %s317_s19 = sshll.u32 %s208_s17, 4  ;;  %s866_s6 = scalar_lea.hbm %s915_s2, %s427_s21  ;;  %s861_s19 = int_to_ptr.vmem [resolvable:$true] %s317_s19 }
  0x5d   : > { %s303_s7 = scalar_lea.sflag [#allocation5], %s848_s18  ;;  %s588_s24 = scalar_lea.vmem %s861_s19, 128 }
  0x5e   : > { %448 = vmatpush3.bf16.msra.mxu0 %v447_v5  ;;  %p589_p13 = scmp.ne.s32.totalorder %s861_s19, %s588_s24  ;;  %s683_s12 = smov [#allocation8]  }
  0x5f   : > { %449 = vmatprep.subr.bf16.mxu0 %v680_v0  ;;  %s592_s22 = sshll.u32 %s683_s12, 4  ;;  %s593_s22 = int_to_ptr.vmem [resolvable:$false] %s592_s22 }
  0x60   : > { %p590_p6 = pnand %p589_p13, %p795_p10  ;;  %s594_s27 = scalar_lea.vmem %s593_s22, 256 }
  0x61   : > { %p595_p12 = scmp.lt.s32.totalorder %s861_s19, %s593_s22  ;;  %p596_p11 = scmp.lt.s32.totalorder %s594_s27, %s588_s24 }
  0x62   : > { %451 = vmatpush3.bf16.msra.mxu0 %v450_v7  ;;  %p591_p8 = pneg %p590_p6 }
  0x63   : > { %p597_p0 = por %p596_p11, %p595_p12 }
  0x65   : > { %444 = vmatmul.mubr.msk.f32.vlgmr.msra.gmra.mrb[0].mxu0 %vm221_vm1, %v215_v8  ;;  %p598_p5 = pnand %p597_p0, %p591_p8 }
 0x138   : > { %v291_v9 = vpop.f32.mrb[0].mxu0 }
 0x139   : > { %301 = vst [vmem:[%s208_s17] sm:$0xff] %v291_v9  ;;  %v445_v10 = vpop.f32.mrb[1].mxu0 }
 0x13a   : > { %601 = shalt.err (!%p598_p5)
}
 0x13b   : > { %s602_s23 = scalar_lea.hbm %s866_s6, 128  ;;  %s606_s3 = scalar_lea.hbm %s915_s2, 256 }
 0x13c   : > { %p603_p9 = scmp.ne.s32.totalorder %s866_s6, %s602_s23  ;;  %p607_p7 = scmp.lt.u32.totalorder %s866_s6, %s915_s2 }
 0x13d   : > { %p608_p3 = scmp.lt.u32.totalorder %s606_s3, %s602_s23  ;;  %p610_p13 = scmp.lt.u32.totalorder %s602_s23, %s866_s6 }
 0x13e   : > { %p604_p1 = pnand %p603_p9, %p795_p10 }
 0x13f   : > { %p609_p4 = por %p608_p3, %p607_p7 }
 0x140   : > { %p605_p2 = pneg %p604_p1 }
 0x141   : > { %p611_p6 = por %p610_p13, %p609_p4 }
 0x143   : > { %p612_p8 = pnand %p611_p6, %p605_p2 }
 0x145   : > { %615 = shalt.err (!%p612_p8)
}
 0x146   : > { %458 = dma.vmem_to_hbm [thread:$0]  (%p795_p10), %s861_s19, 128, %s866_s6, %s303_s7  }
 0x147 PF: > { %s329_s15 = sand.u32 1, %s654_s9   ;;  %p933_p12 = scmp.ne.s32.totalorder %s923_s20, 0 }
 0x148   : > { %p934_p11 = scmp.ge.s32.totalorder %s674_s14, 2  ;;  %s330_s16 = scalar_lea.sflag [#allocation5], %s329_s15 }
 0x14a   : > { %p469_p0 = pnand %p934_p11, %p933_p12 }
 0x14c   : > { %649 = dma.done.wait (!%p469_p0), %s330_s16, 128  }
 0x14d   : > { %651 = vsyncadd (!%p469_p0), %s330_s16, 4294967168  ;;  %s19_s14 = sadd.s32 1, %s674_s14   ;;  %s935_s9 = smov %s658_s10 }
 0x14e   : > { %p16_p5 = scmp.ge.s32.totalorder %s19_s14, 4   ;;  %s936_s10 = smov %s662_s11 }
 0x14f   : > { %s937_s11 = smov %s804_s28  ;;  %s938_s12 = smov %s670_s13 }
 0x150   : > { %s939_s13 = smov %s941_s25  ;;  %18 = sbr.rel (!%p16_p5) target bundleno = 7 (0x7), region = 86 }
 0x157   :  { %335 = vsyncpa [#allocation4], 1 }
 0x158   :  { %337 = vsyncpa [#allocation4 + $0x1], 1 }
 0x159   :  { %338 = vsyncpa [#allocation7], 1 }
 0x15a   :  { %339 = vsyncpa [#allocation5], 1 }
 0x15b   :  { %341 = vsyncpa [#allocation5 + $0x1], 1 }

</bundles_post_ra>
